<compile_context>
chip_gen: v7x
topology: tpu7x:2x2x1
jax: 0.10.0
libtpu: 0.0.40
codegen_flags: <defaults>
</compile_context>

<pallas_src>
import functools

import jax
import jax.numpy as jnp
from jax import lax
from jax.experimental import pallas as pl
from jax.experimental.pallas import tpu as pltpu


def _round_up(n, m):
    return ((n + m - 1) // m) * m


def _cdiv(a, b):
    return (a + b - 1) // b


# VMEM budget for the double-buffered x tile (safe under every generation's
# scoped-VMEM default: v5e 16 MiB, v6e/v7x 32 MiB scoped / 64-128 MiB physical).
_X_DBLBUF_BUDGET = 4 * 1024 * 1024


def fraudnet_kernel(x_ref, w1t_ref, b1t_ref, w2t_ref, b2t_ref, w3c_ref, b3_ref,
                    o_ref):
    """One batch tile. x tile is [TB, F]; all activations keep batch on lanes."""
    x = x_ref[...]                                               # [TB, F]

    # fc1 + ReLU: contract x's last dim with w1t's last dim -> [32, TB]
    # (batch lands on lanes; MXU accumulates in f32).
    h1 = lax.dot_general(
        w1t_ref[...], x.astype(w1t_ref.dtype),
        dimension_numbers=(((1,), (1,)), ((), ())),
        preferred_element_type=jnp.float32) + b1t_ref[...]        # [32, TB]
    h1 = jnp.maximum(h1, 0.0)
    # dropout(p=0.2) -> identity in eval mode

    # fc2 + ReLU
    h2 = jnp.dot(w2t_ref[...], h1.astype(w2t_ref.dtype),
                 preferred_element_type=jnp.float32) + b2t_ref[...]  # [16, TB]
    h2 = jnp.maximum(h2, 0.0)
    # dropout(p=0.2) -> identity in eval mode

    # fc3 on VPU/XLU: broadcast w3 over lanes, multiply, 16-row sublane sum.
    # Avoids an awkward [1,16]@[16,TB] MXU call / 1-sublane result pop.
    logits = jnp.sum(h2 * w3c_ref[...], axis=0, keepdims=True) + b3_ref[0, 0]
    o_ref[...] = logits.astype(o_ref.dtype)                      # [1, TB]


@functools.partial(jax.jit, static_argnames=("tile_b_max", "compute_dtype"))
def fraudnet_forward(x, params, *, tile_b_max=16384, compute_dtype=jnp.float32):
    """x: [B, num_features]. params: dict of w1,b1,w2,b2,w3,b3 ([in,out] weights).

    Returns logits of shape [B, 1] (float32), matching the PyTorch module.
    """
    B, F = x.shape
    x_bytes = jnp.dtype(x.dtype).itemsize

    # ---- batch tile sizing (lane-dense: multiple of 128) -------------------
    by_vmem = max(128, ((_X_DBLBUF_BUDGET // (2 * F * x_bytes)) // 128) * 128)
    tile_b = min(int(tile_b_max), by_vmem, max(128, _round_up(B, 128)))
    if B > 256:
        # Keep >= 2 grid steps so the "parallel" batch axis can shard across
        # both TensorCores on v7x (harmless on v5e/v6e).
        tile_b = min(tile_b, max(128, _round_up(_cdiv(B, 2), 128)))
    tile_b = max(128, (tile_b // 128) * 128)

    num_blocks = _cdiv(B, tile_b)
    b_out = num_blocks * tile_b          # padded output lanes only (tiny)

    # ---- weights: pre-transpose once (a few KB, negligible) ----------------
    w1t = jnp.transpose(params["w1"]).astype(compute_dtype)     # [32, F]
    w2t = jnp.transpose(params["w2"]).astype(compute_dtype)     # [16, 32]
    w3c = params["w3"].astype(jnp.float32)                      # [16, 1] (VPU path)
    b1t = jnp.transpose(params["b1"]).astype(jnp.float32)       # [32, 1]
    b2t = jnp.transpose(params["b2"]).astype(jnp.float32)       # [16, 1]
    b3 = params["b3"].reshape(1, 1).astype(jnp.float32)         # [1, 1] scalar (SMEM)

    const = lambda i: (0, 0)   # weights/biases stay VMEM-resident across the grid

    flops = 2 * B * (32 * F + 16 * 32 + 16)
    bytes_accessed = (B * F * x_bytes + b_out * 4
                      + (F * 32 + 32 + 32 * 16 + 16 + 16 + 1) * 4)

    out_T = pl.pallas_call(
        fraudnet_kernel,
        out_shape=jax.ShapeDtypeStruct((1, b_out), jnp.float32),
        grid=(num_blocks,),
        in_specs=[
            pl.BlockSpec((tile_b, F), lambda i: (i, 0)),        # x tile (contiguous DMA)
            pl.BlockSpec((32, F), const),
            pl.BlockSpec((32, 1), const),
            pl.BlockSpec((16, 32), const),
            pl.BlockSpec((16, 1), const),
            pl.BlockSpec((16, 1), const),
            pl.BlockSpec(memory_space=pltpu.MemorySpace.SMEM),  # b3 scalar
        ],
        out_specs=pl.BlockSpec((1, tile_b), lambda i: (0, i)),  # lane-dense output
        compiler_params=pltpu.CompilerParams(
            dimension_semantics=("parallel",),
            vmem_limit_bytes=32 * 1024 * 1024),
        cost_estimate=pl.CostEstimate(flops=flops, transcendentals=0,
                                      bytes_accessed=bytes_accessed),
    )(x, w1t, b1t, w2t, b2t, w3c, b3)

    # Drop padded lanes, back to the PyTorch-shaped output [B, 1].
    return jnp.transpose(out_T[:, :B])


def init_params(num_features, key):
    """Deterministic init mimicking PyTorch nn.Linear default U(-1/sqrt(fan_in), +1/sqrt(fan_in))."""
    ks = jax.random.split(key, 6)

    def linear(kw, kb, fan_in, fan_out):
        bound = 1.0 / jnp.sqrt(jnp.float32(fan_in))
        w = jax.random.uniform(kw, (fan_in, fan_out), jnp.float32, -bound, bound)
        b = jax.random.uniform(kb, (1, fan_out), jnp.float32, -bound, bound)
        return w, b

    w1, b1 = linear(ks[0], ks[1], num_features, 32)
    w2, b2 = linear(ks[2], ks[3], 32, 16)
    w3, b3 = linear(ks[4], ks[5], 16, 1)
    return {"w1": w1, "b1": b1, "w2": w2, "b2": b2, "w3": w3, "b3": b3}


if __name__ == "__main__":
    key = jax.random.PRNGKey(0)
    k_x, k_p = jax.random.split(key)

    batch = 8
    num_features = 16
    x = jax.random.normal(k_x, (batch, num_features), jnp.float32)
    params = init_params(num_features, k_p)

    out = fraudnet_forward(x, params)       # f32 path for a tight correctness check
    out = jax.block_until_ready(out)

    # Pure-JAX reference (eval-mode dropout = identity).
    h1 = jnp.maximum(x @ params["w1"] + params["b1"], 0.0)
    h2 = jnp.maximum(h1 @ params["w2"] + params["b2"], 0.0)
    ref = h2 @ params["w3"] + params["b3"]

    assert out.shape == (batch, 1)
    assert jnp.allclose(out, ref, atol=1e-5, rtol=1e-5)

    print("KERNEL_OK")
</pallas_src>

<mosaic_0001>
module attributes {stable_mosaic.version = 11 : i64} {
  func.func @fraudnet_kernel(%arg0: i32, %arg1: memref<128x16xf32, #tpu.memory_space<vmem>>, %arg2: memref<32x16xf32, #tpu.memory_space<vmem>>, %arg3: memref<32x1xf32, #tpu.memory_space<vmem>>, %arg4: memref<16x32xf32, #tpu.memory_space<vmem>>, %arg5: memref<16x1xf32, #tpu.memory_space<vmem>>, %arg6: memref<16x1xf32, #tpu.memory_space<vmem>>, %arg7: memref<1x1xf32, #tpu.memory_space<smem>>, %arg8: memref<1x128xf32, #tpu.memory_space<vmem>>) attributes {dimension_semantics = [#tpu.dimension_semantics<parallel>], iteration_bounds = array<i64: 1>, scalar_prefetch = 0 : i64, scratch_operands = 0 : i64, tpu.core_type = #tpu.core_type<tc>, window_params = [{transform_indices = @transform_0, window_bounds = array<i64: 128, 16>}, {pipeline_mode = #tpu.pipeline_mode<synchronous>, transform_indices = @transform_1, window_bounds = array<i64: 32, 16>}, {pipeline_mode = #tpu.pipeline_mode<synchronous>, transform_indices = @transform_2, window_bounds = array<i64: 32, 1>}, {pipeline_mode = #tpu.pipeline_mode<synchronous>, transform_indices = @transform_3, window_bounds = array<i64: 16, 32>}, {pipeline_mode = #tpu.pipeline_mode<synchronous>, transform_indices = @transform_4, window_bounds = array<i64: 16, 1>}, {pipeline_mode = #tpu.pipeline_mode<synchronous>, transform_indices = @transform_5, window_bounds = array<i64: 16, 1>}, {transform_indices = @transform_6, window_bounds = array<i64: 1, 1>}, {transform_indices = @transform_7, window_bounds = array<i64: 1, 128>}]} {
    %c0 = arith.constant 0 : index
    %c0_0 = arith.constant 0 : index
    %0 = vector.load %arg1[%c0, %c0_0] : memref<128x16xf32, #tpu.memory_space<vmem>>, vector<128x16xf32>
    %c0_1 = arith.constant 0 : index
    %c0_2 = arith.constant 0 : index
    %1 = vector.load %arg2[%c0_1, %c0_2] : memref<32x16xf32, #tpu.memory_space<vmem>>, vector<32x16xf32>
    %cst = arith.constant dense<0.000000e+00> : vector<32x128xf32>
    %2 = tpu.matmul %1, %0, %cst {dimension_numbers = #tpu.dot_dimension_numbers<[1], [1], [0], [0], [0, 0, 1, 0], [], []>} : vector<32x16xf32>, vector<128x16xf32>, vector<32x128xf32> -> vector<32x128xf32>
    %c0_3 = arith.constant 0 : index
    %c0_4 = arith.constant 0 : index
    %3 = vector.load %arg3[%c0_3, %c0_4] : memref<32x1xf32, #tpu.memory_space<vmem>>, vector<32x1xf32>
    %4 = vector.broadcast %3 : vector<32x1xf32> to vector<32x128xf32>
    %5 = arith.addf %2, %4 : vector<32x128xf32>
    %cst_5 = arith.constant 0.000000e+00 : f32
    %6 = vector.broadcast %cst_5 : f32 to vector<32x128xf32>
    %7 = arith.maximumf %5, %6 : vector<32x128xf32>
    %c0_6 = arith.constant 0 : index
    %c0_7 = arith.constant 0 : index
    %8 = vector.load %arg4[%c0_6, %c0_7] : memref<16x32xf32, #tpu.memory_space<vmem>>, vector<16x32xf32>
    %cst_8 = arith.constant dense<0.000000e+00> : vector<16x128xf32>
    %9 = tpu.matmul %8, %7, %cst_8 {dimension_numbers = #tpu.dot_dimension_numbers<[1], [0], [0], [1], [0, 0, 1, 1], [], []>} : vector<16x32xf32>, vector<32x128xf32>, vector<16x128xf32> -> vector<16x128xf32>
    %c0_9 = arith.constant 0 : index
    %c0_10 = arith.constant 0 : index
    %10 = vector.load %arg5[%c0_9, %c0_10] : memref<16x1xf32, #tpu.memory_space<vmem>>, vector<16x1xf32>
    %11 = vector.broadcast %10 : vector<16x1xf32> to vector<16x128xf32>
    %12 = arith.addf %9, %11 : vector<16x128xf32>
    %cst_11 = arith.constant 0.000000e+00 : f32
    %13 = vector.broadcast %cst_11 : f32 to vector<16x128xf32>
    %14 = arith.maximumf %12, %13 : vector<16x128xf32>
    %c0_12 = arith.constant 0 : index
    %c0_13 = arith.constant 0 : index
    %15 = vector.load %arg6[%c0_12, %c0_13] : memref<16x1xf32, #tpu.memory_space<vmem>>, vector<16x1xf32>
    %16 = vector.broadcast %15 : vector<16x1xf32> to vector<16x128xf32>
    %17 = arith.mulf %14, %16 : vector<16x128xf32>
    %cst_14 = arith.constant dense<0.000000e+00> : vector<128xf32>
    %18 = vector.multi_reduction <add>, %17, %cst_14 [0] : vector<16x128xf32> to vector<128xf32>
    %19 = vector.shape_cast %18 : vector<128xf32> to vector<1x128xf32>
    %c0_15 = arith.constant 0 : index
    %c0_16 = arith.constant 0 : index
    %20 = memref.load %arg7[%c0_15, %c0_16] : memref<1x1xf32, #tpu.memory_space<smem>>
    %21 = vector.broadcast %20 : f32 to vector<1x128xf32>
    %22 = arith.addf %19, %21 : vector<1x128xf32>
    %c0_17 = arith.constant 0 : index
    %c0_18 = arith.constant 0 : index
    %23 = vector.load %arg8[%c0_17, %c0_18] : memref<1x128xf32, #tpu.memory_space<vmem>>, vector<1x128xf32>
    tpu.vector_store %arg8[%c0_17, %c0_18], %22 {strides = array<i32>} : memref<1x128xf32, #tpu.memory_space<vmem>>, vector<1x128xf32>,
    return
  }
  func.func @transform_0(%arg0: i32) -> (i32, i32) {
    %c0_i32 = arith.constant 0 : i32
    %c0_i32_0 = arith.constant 0 : i32
    return %arg0, %c0_i32 : i32, i32
  }
  func.func @transform_1(%arg0: i32) -> (i32, i32) {
    %c0_i32 = arith.constant 0 : i32
    %c0_i32_0 = arith.constant 0 : i32
    %c0_i32_1 = arith.constant 0 : i32
    return %c0_i32, %c0_i32_0 : i32, i32
  }
  func.func @transform_2(%arg0: i32) -> (i32, i32) {
    %c0_i32 = arith.constant 0 : i32
    %c0_i32_0 = arith.constant 0 : i32
    %c0_i32_1 = arith.constant 0 : i32
    return %c0_i32, %c0_i32_0 : i32, i32
  }
  func.func @transform_3(%arg0: i32) -> (i32, i32) {
    %c0_i32 = arith.constant 0 : i32
    %c0_i32_0 = arith.constant 0 : i32
    %c0_i32_1 = arith.constant 0 : i32
    return %c0_i32, %c0_i32_0 : i32, i32
  }
  func.func @transform_4(%arg0: i32) -> (i32, i32) {
    %c0_i32 = arith.constant 0 : i32
    %c0_i32_0 = arith.constant 0 : i32
    %c0_i32_1 = arith.constant 0 : i32
    return %c0_i32, %c0_i32_0 : i32, i32
  }
  func.func @transform_5(%arg0: i32) -> (i32, i32) {
    %c0_i32 = arith.constant 0 : i32
    %c0_i32_0 = arith.constant 0 : i32
    %c0_i32_1 = arith.constant 0 : i32
    return %c0_i32, %c0_i32_0 : i32, i32
  }
  func.func @transform_6(%arg0: i32) -> (i32, i32) {
    %c0_i32 = arith.constant 0 : i32
    %c0_i32_0 = arith.constant 0 : i32
    %c0_i32_1 = arith.constant 0 : i32
    return %c0_i32, %c0_i32_0 : i32, i32
  }
  func.func @transform_7(%arg0: i32) -> (i32, i32) {
    %c0_i32 = arith.constant 0 : i32
    %c0_i32_0 = arith.constant 0 : i32
    return %c0_i32, %arg0 : i32, i32
  }
}

</mosaic_0001>

<bundles_post_ra>
// kernel: fraudnet_forward.1
= control target key start
LH: loop header
LB: loop body
LE: loop exit
PB: predicated region body
PF: predicated region fallthrough
CT: control target
= control target key end

     0   :  { %vm71_vm0 = vcmask 130048   ;;  %v504_v3 = vmov 0   ;;  %vm235_vm2 = vcmask 261120   ;;  %s685_s0 = inlined_call_operand.vmem [shape: f32[8,16], index: 0, kind: input, shape index: {}]   ;;  %s686_s1 = inlined_call_operand.vmem [shape: f32[32,16], index: 1, kind: input, shape index: {}]   ;;  %s687_s2 = inlined_call_operand.vmem [shape: f32[32,1], index: 2, kind: input, shape index: {}]   ;;  %s688_s4 = inlined_call_operand.vmem [shape: f32[16,1], index: 4, kind: input, shape index: {}]   ;;  %s689_s5 = inlined_call_operand.vmem [shape: f32[16,1], index: 5, kind: input, shape index: {}]   ;;  %s690_s3 = inlined_call_operand.vmem [shape: f32[16,32], index: 3, kind: input, shape index: {}]   ;;  %s691_s6 = inlined_call_operand.<no memory space> [shape: f32[1,1], index: 6, kind: input, shape index: {}]   ;;  %s692_s7 = inlined_call_operand.vmem [shape: f32[1,128], index: 7, kind: output, shape index: {}]  }
   0x1   :  { %v27_v0 = vld [vmem:[%s685_s0] sm:$0xff]  ;;  %v28_v1 = vld [vmem:[%s685_s0 + $0x8] sm:$0xff]  ;;  %vm553_vm1 = vmpackc.low %vm71_vm0, %vm71_vm0  ;;  %502 = vset.pattern.permute.xlu0 %v504_v3  ;;  %503 = vset.pattern.permute.xlu1 %v504_v3 }
   0x2   :  { %v445_v4 = vpack.c.bf16 %v28_v1, %v27_v0  ;;  %v29_v5 = vld [vmem:[%s685_s0 + $0x10] sm:$0xff]  ;;  %v30_v6 = vld [vmem:[%s685_s0 + $0x18] sm:$0xff]  ;;  %v43_v8 = vld [vmem:[%s686_s1] sm:$0xff] }
   0x3   :  { %v451_v7 = vpack.c.bf16 %v30_v6, %v29_v5  ;;  %v31_v9 = vld [vmem:[%s685_s0 + $0x20] sm:$0xff]  ;;  %v32_v10 = vld [vmem:[%s685_s0 + $0x28] sm:$0xff]  ;;  %428 = vmatprep.mubr.msk.f32.mxu0 %vm71_vm0, %v43_v8  ;;  %v49_v12 = vld [vmem:[%s687_s2 + $0x10] sm:$0xff] }
   0x4   :  { %447 = vmatprep.subr.msk.bf16.mxu0 %vm553_vm1, %v445_v4  ;;  %v47_v11 = vld [vmem:[%s687_s2] sm:$0xff]  ;;  %63 = vperm.xlu1 %503, %v49_v12   ;;  %v457_v13 = vpack.c.bf16 %v32_v10, %v31_v9  ;;  %v48_v14 = vld [vmem:[%s687_s2 + $0x8] sm:$0xff]  ;;  %v50_v15 = vld [vmem:[%s687_s2 + $0x18] sm:$0xff]  ;;  %v341_v12 = vstv %s691_s6 }
   0x5   :  { %450 = vmatpush3.bf16.xpose.msk.msra.mxu0 %vm553_vm1, %v445_v4  ;;  %53 = vperm.xlu0 %502, %v47_v11   ;;  %v223_v16 = vld [vmem:[%s688_s4] sm:$0xff]  ;;  %v33_v17 = vld [vmem:[%s685_s0 + $0x30] sm:$0xff]  ;;  %v34_v18 = vld [vmem:[%s685_s0 + $0x38] sm:$0xff] }
   0x6   :  { %453 = vmatprep.subr.msk.bf16.mxu0 %vm553_vm1, %v451_v7  ;;  %v224_v19 = vld [vmem:[%s688_s4 + $0x8] sm:$0xff]  ;;  %v463_v20 = vpack.c.bf16 %v34_v18, %v33_v17  ;;  %v319_v21 = vld [vmem:[%s689_s5] sm:$0xff]  ;;  %v37_v26 = vld [vmem:[%s685_s0 + $0x50] sm:$0xff] }
   0x7   :  { %v320_v22 = vld [vmem:[%s689_s5 + $0x8] sm:$0xff]  ;;  %v35_v23 = vld [vmem:[%s685_s0 + $0x40] sm:$0xff]  ;;  %v38_v27 = vld [vmem:[%s685_s0 + $0x58] sm:$0xff] }
   0x8   :  { %68 = vperm.xlu1 %503, %v50_v15   ;;  %v36_v24 = vld [vmem:[%s685_s0 + $0x48] sm:$0xff]  ;;  %v475_v28 = vpack.c.bf16 %v38_v27, %v37_v26  ;;  %v39_v29 = vld [vmem:[%s685_s0 + $0x60] sm:$0xff]  ;;  %v41_v32 = vld [vmem:[%s685_s0 + $0x70] sm:$0xff] }
   0x9   :  { %58 = vperm.xlu0 %502, %v48_v14   ;;  %v469_v25 = vpack.c.bf16 %v36_v24, %v35_v23  ;;  %v40_v30 = vld [vmem:[%s685_s0 + $0x68] sm:$0xff]  ;;  %v42_v33 = vld [vmem:[%s685_s0 + $0x78] sm:$0xff]  ;;  %v45_v36 = vld [vmem:[%s686_s1 + $0x10] sm:$0xff] }
   0xa   :  { %v481_v31 = vpack.c.bf16 %v40_v30, %v39_v29  ;;  %v487_v34 = vpack.c.bf16 %v42_v33, %v41_v32  ;;  %v44_v35 = vld [vmem:[%s686_s1 + $0x8] sm:$0xff]  ;;  %v46_v37 = vld [vmem:[%s686_s1 + $0x18] sm:$0xff]  ;;  %v221_v38 = vld [vmem:[%s690_s3] sm:$0xff] }
   0xb   :  { %442 = vmatprep.mubr.msk.f32.mxu1 %vm235_vm2, %v221_v38  ;;  %v222_v57 = vld [vmem:[%s690_s3 + $0x8] sm:$0xff] }
   0xc   :  { %232 = vperm.xlu1 %503, %v224_v19  }
   0xd   :  { %456 = vmatpush3.bf16.xpose.msk.msra.mxu0 %vm553_vm1, %v451_v7  ;;  %227 = vperm.xlu0 %502, %v223_v16  }
   0xe   :  { %459 = vmatprep.subr.msk.bf16.mxu0 %vm553_vm1, %v457_v13 }
  0x10   :  { %328 = vperm.xlu1 %503, %v320_v22  }
  0x11   :  { %323 = vperm.xlu0 %502, %v319_v21  }
  0x15   :  { %462 = vmatpush3.bf16.xpose.msk.msra.mxu0 %vm553_vm1, %v457_v13 }
  0x16   :  { %465 = vmatprep.subr.msk.bf16.mxu0 %vm553_vm1, %v463_v20 }
  0x1d   :  { %468 = vmatpush3.bf16.xpose.msk.msra.mxu0 %vm553_vm1, %v463_v20 }
  0x1e   :  { %471 = vmatprep.subr.msk.bf16.mxu0 %vm553_vm1, %v469_v25 }
  0x25   :  { %474 = vmatpush3.bf16.xpose.msk.msra.mxu0 %vm553_vm1, %v469_v25 }
  0x26   :  { %477 = vmatprep.subr.msk.bf16.mxu0 %vm553_vm1, %v475_v28 }
  0x2d   :  { %480 = vmatpush3.bf16.xpose.msk.msra.mxu0 %vm553_vm1, %v475_v28 }
  0x2e   :  { %483 = vmatprep.subr.msk.bf16.mxu0 %vm553_vm1, %v481_v31 }
  0x35   :  { %486 = vmatpush3.bf16.xpose.msk.msra.mxu0 %vm553_vm1, %v481_v31 }
  0x36   :  { %489 = vmatprep.subr.msk.bf16.mxu0 %vm553_vm1, %v487_v34 }
  0x3d   :  { %492 = vmatpush3.bf16.xpose.msk.msra.mxu0 %vm553_vm1, %v487_v34 }
  0x44   :  { %429 = vmatmul.mubr.msk.f32.vlgmr.msra.gmra.mrb[0].mxu0 %vm71_vm0, %v44_v35 }
  0x45   :  { %431 = vmatprep.mubr.msk.f32.mxu0 %vm71_vm0, %v45_v36 }
  0x48   :  { %432 = vmatmul.mubr.msk.f32.gmra.mrb[2].mxu0 %vm71_vm0, %v46_v37 }
  0x83   :  { %v64_v40 = vpop.permute.xlu1 %63 }
  0x84   :  { %v54_v39 = vpop.permute.xlu0 %53 }
  0x87   :  { %v69_v47 = vpop.permute.xlu1 %68 }
  0x88   :  { %v59_v41 = vpop.permute.xlu0 %58 }
  0x8b   :  { %v233_v58 = vpop.permute.xlu1 %232 }
  0x8c   :  { %v228_v59 = vpop.permute.xlu0 %227 }
  0x8f   :  { %v329_v1 = vpop.permute.xlu1 %328 }
  0x90   :  { %v324_v3 = vpop.permute.xlu0 %323 }
 0x117   :  { %v430_v42 = vpop.f32.mrb[0].mxu0 }
 0x118   :  { %v204_v43 = vadd.f32 %v430_v42, %v59_v41  ;;  %v198_v44 = vpop.f32.mrb[1].mxu0 }
 0x119   :  { %v199_v45 = vadd.f32 %v198_v44, %v54_v39 }
 0x11a   :  { %v218_v46 = vmax.f32 %v204_v43, 0.0 }
 0x11b   :  { %v217_v48 = vmax.f32 %v199_v45, 0.0  ;;  %v433_v49 = vpop.f32.mrb[2].mxu0 }
 0x11c   :  { %v214_v50 = vadd.f32 %v433_v49, %v69_v47  ;;  %v208_v51 = vpop.f32.mrb[3].mxu0 }
 0x11d   :  { %v209_v52 = vadd.f32 %v208_v51, %v64_v40  ;;  %v493_v53 = vpack.c.bf16 %v218_v46, %v217_v48 }
 0x11e   :  { %v220_v54 = vmax.f32 %v214_v50, 0.0 }
 0x11f   :  { %v219_v55 = vmax.f32 %v209_v52, 0.0  ;;  %494 = vmatprep.subr.bf16.mxu1 %v493_v53 }
 0x120   :  { %496 = vmatpush3.bf16.msra.mxu1 %v493_v53 }
 0x121   :  { %v497_v56 = vpack.c.bf16 %v220_v54, %v219_v55 }
 0x123   :  { %498 = vmatprep.subr.bf16.mxu1 %v497_v56 }
 0x124   :  { %500 = vmatpush3.bf16.msra.mxu1 %v497_v56 }
 0x127   :  { %443 = vmatmul.mubr.msk.f32.vlgmr.msra.gmra.mrb[0].mxu1 %vm235_vm2, %v222_v57 }
 0x1fa   :  { %v444_v60 = vpop.f32.mrb[0].mxu1 }
 0x1fb   :  { %v314_v61 = vadd.f32 %v444_v60, %v233_v58  ;;  %v308_v62 = vpop.f32.mrb[1].mxu1 }
 0x1fc   :  { %v309_v63 = vadd.f32 %v308_v62, %v228_v59 }
 0x1fd   :  { %v318_v0 = vmax.f32 %v314_v61, 0.0 }
 0x1fe   :  { %v317_v2 = vmax.f32 %v309_v63, 0.0 }
 0x1ff   :  { %v332_v4 = vmul.f32 %v329_v1, %v318_v0 }
 0x200   :  { %v331_v5 = vmul.f32 %v324_v3, %v317_v2 }
 0x202   :  { %v333_v6 = vadd.f32 %v332_v4, %v331_v5 }
 0x204   :  { %v334_v7 = vrot.slane %v333_v6, 4 }
 0x206   :  { %v335_v8 = vadd.f32 %v334_v7, %v333_v6 }
 0x208   :  { %v336_v9 = vrot.slane %v335_v8, 2 }
 0x20a   :  { %v337_v10 = vadd.f32 %v336_v9, %v335_v8 }
 0x20c   :  { %v338_v11 = vrot.slane %v337_v10, 1 }
 0x20e   :  { %v339_v13 = vadd.f32 %v338_v11, %v337_v10 }
 0x210   :  { %v342_v14 = vadd.f32 %v341_v12, %v339_v13 }
 0x212   :  { %343 = vst [vmem:[%s692_s7] sm:$0x1] %v342_v14 }

</bundles_post_ra>
